<compile_context>
chip_gen: v6e
topology: v6e:2x2x1
jax: 0.10.0
libtpu: 0.0.40
codegen_flags: <defaults>
</compile_context>

<pallas_src>
import jax
import jax.numpy as jnp
from jax.experimental import pallas as pl
from jax.experimental.pallas import tpu as pltpu


SUBLANE = 8     # sublane width (second-to-last-dim alignment for row tiles)


def _round_up(n, m):
    return ((n + m - 1) // m) * m


# ----------------------------------------------------------------------------
# Fused MLP kernel: all layers in one kernel body, h stays in VMEM/vregs.
# ----------------------------------------------------------------------------
def _make_fused_mlp_kernel(nlayers):
    def kernel(*refs):
        x_ref = refs[0]
        w_refs = refs[1:1 + nlayers]
        b_refs = refs[1 + nlayers:1 + 2 * nlayers]
        o_ref = refs[-1]

        h = x_ref[...]                                    # [tm, d0] f32
        for i in range(nlayers):
            if i < nlayers - 1:
                # dropout == identity in eval mode; relu fused (f32 VPU work
                # hidden under the MXU pass).
                h = jnp.maximum(h, 0.0)
            # bf16 MXU operands, f32 accumulation; bias add stays f32.
            h = jnp.dot(h.astype(jnp.bfloat16), w_refs[i][...],
                        preferred_element_type=jnp.float32) + b_refs[i][...]
        o_ref[...] = h.astype(o_ref.dtype)

    return kernel


def mlp_forward(params, x):
    """params: list of (W [d_in, d_out], b [d_out]); x: [N, in_dim]."""
    nlayers = len(params)
    n, in_dim = x.shape
    out_dim = params[-1][0].shape[1]
    dims = [in_dim] + [w.shape[1] for (w, _) in params]

    # --- row tiling: target >=2 (ideally 4) grid steps when N allows --------
    n_s = _round_up(n, SUBLANE)
    target_steps = 4
    tm = max(SUBLANE, min(256, _round_up(pl.cdiv(n_s, target_steps), SUBLANE)))

    # --- explicit VMEM budget (weights/biases resident, x/out double-buffered)
    def footprint(tm_):
        w_bytes = sum(dims[i] * dims[i + 1] for i in range(nlayers)) * 2   # bf16
        b_bytes = sum(dims[1:]) * 4                                        # f32
        io_bytes = (tm_ * dims[0] + tm_ * dims[-1]) * 4 * 2                # 2 bufs
        return w_bytes + b_bytes + io_bytes

    while footprint(tm) > (24 << 20) and tm > SUBLANE:
        tm //= 2                      # shrink row tile if VMEM-bound (v7x 64 MiB)
        tm = _round_up(tm, SUBLANE)

    n_p = _round_up(n_s, tm)
    grid = (n_p // tm,)

    # --- inputs: only row padding (layout plumbing), weights in bf16 ---------
    x_p = x.astype(jnp.float32)
    if n_p != n:
        x_p = jnp.pad(x_p, ((0, n_p - n), (0, 0)))
    ws = [w.astype(jnp.bfloat16) for (w, _) in params]
    bs = [b.reshape(1, -1).astype(jnp.float32) for (_, b) in params]

    # --- advisory cost estimate from TRUE dims -------------------------------
    flops = sum(2 * n * dims[i] * dims[i + 1] for i in range(nlayers))
    bytes_accessed = (
        4 * n * dims[0]                                           # x
        + 2 * sum(dims[i] * dims[i + 1] for i in range(nlayers))  # bf16 weights
        + 4 * sum(dims[1:])                                       # biases
        + 4 * n * dims[-1])                                       # output

    vmem_limit = int(min(max(2 * footprint(tm) + (4 << 20), 16 << 20), 32 << 20))

    def build_call(use_buffered):
        # Constant-index weights/biases: single-buffer them (no pipelining win,
        # halves their VMEM footprint).
        const_kwargs = {"pipeline_mode": pl.Buffered(1)} if use_buffered else {}

        in_specs = [pl.BlockSpec((tm, dims[0]), lambda i: (i, 0))]
        for k in range(nlayers):
            in_specs.append(pl.BlockSpec((dims[k], dims[k + 1]),
                                         lambda i: (0, 0), **const_kwargs))
        for k in range(nlayers):
            in_specs.append(pl.BlockSpec((1, dims[k + 1]),
                                         lambda i: (0, 0), **const_kwargs))
        out_specs = pl.BlockSpec((tm, dims[-1]), lambda i: (i, 0))

        return pl.pallas_call(
            _make_fused_mlp_kernel(nlayers),
            out_shape=jax.ShapeDtypeStruct((n_p, dims[-1]), jnp.float32),
            grid=grid,
            in_specs=in_specs,
            out_specs=out_specs,
            compiler_params=pltpu.CompilerParams(
                dimension_semantics=("parallel",),
                vmem_limit_bytes=vmem_limit),
            cost_estimate=pl.CostEstimate(
                flops=int(flops), transcendentals=0,
                bytes_accessed=int(bytes_accessed)),
        )

    try:
        out_p = build_call(True)(x_p, *ws, *bs)
    except Exception:
        # Fallback: some builds may reject Buffered(1) single-buffering.
        out_p = build_call(False)(x_p, *ws, *bs)

    out = out_p[:n]
    if out_dim == 1:                       # torch .squeeze(-1)
        out = out[..., 0]
    return out


# ----------------------------------------------------------------------------
# Parameter construction (deterministic, matches nn.Linear shapes; stored as
# [in, out] so the MXU pass needs no transpose).
# ----------------------------------------------------------------------------
def init_mlp_params(key, in_dim, out_dim, nlayers):
    params = []
    k = key
    d1 = in_dim
    for _ in range(nlayers - 1):
        d2 = d1 // 2
        k, kw, kb = jax.random.split(k, 3)
        bound = 1.0 / jnp.sqrt(d1)
        w = jax.random.uniform(kw, (d1, d2), jnp.float32, -bound, bound)
        b = jax.random.uniform(kb, (d2,), jnp.float32, -bound, bound)
        params.append((w, b))
        d1 = d2
    k, kw, kb = jax.random.split(k, 3)
    bound = 1.0 / jnp.sqrt(d1)
    w = jax.random.uniform(kw, (d1, out_dim), jnp.float32, -bound, bound)
    b = jax.random.uniform(kb, (out_dim,), jnp.float32, -bound, bound)
    params.append((w, b))
    return params


# Pure-JAX f32 reference (for in-script correctness check only).
def _mlp_ref(params, x):
    h = x
    nlayers = len(params)
    for i, (w, b) in enumerate(params):
        if i < nlayers - 1:
            h = jnp.maximum(h, 0.0)
        h = h @ w + b
    if h.shape[-1] == 1:
        h = h[..., 0]
    return h


# ----------------------------------------------------------------------------
# Main
# ----------------------------------------------------------------------------
if __name__ == "__main__":
    # Small shapes consistent with the module: MLP(in_dim=32, out_dim=4, nlayers=3)
    #   -> relu + Linear(32,16); relu + Linear(16,8); Linear(8,4)
    N = 8
    IN_DIM = 32
    OUT_DIM = 4
    NLAYERS = 3

    key = jax.random.PRNGKey(0)
    key, kx, kp = jax.random.split(key, 3)

    embedding = jax.random.normal(kx, (N, IN_DIM), jnp.float32)
    params = init_mlp_params(kp, IN_DIM, OUT_DIM, NLAYERS)

    out = mlp_forward(params, embedding)
    out = jax.block_until_ready(out)

    assert out.shape == (N, OUT_DIM), out.shape
    assert bool(jnp.all(jnp.isfinite(out)))

    ref = _mlp_ref(params, embedding)
    # bf16 MXU inputs with f32 accumulation -> small drift vs f32 reference,
    # so the tolerance is loosened accordingly.
    assert jnp.allclose(out, ref, atol=5e-2, rtol=5e-2), float(
        jnp.max(jnp.abs(out - ref)))

    print("KERNEL_OK")
</pallas_src>

<mosaic_0001>
module attributes {stable_mosaic.version = 11 : i64} {
  func.func @kernel(%arg0: i32, %arg1: memref<8x32xf32, #tpu.memory_space<vmem>>, %arg2: memref<32x16xbf16, #tpu.memory_space<vmem>>, %arg3: memref<16x8xbf16, #tpu.memory_space<vmem>>, %arg4: memref<8x4xbf16, #tpu.memory_space<vmem>>, %arg5: memref<1x16xf32, #tpu.memory_space<vmem>>, %arg6: memref<1x8xf32, #tpu.memory_space<vmem>>, %arg7: memref<1x4xf32, #tpu.memory_space<vmem>>, %arg8: memref<8x4xf32, #tpu.memory_space<vmem>>) attributes {dimension_semantics = [#tpu.dimension_semantics<parallel>], iteration_bounds = array<i64: 1>, scalar_prefetch = 0 : i64, scratch_operands = 0 : i64, tpu.core_type = #tpu.core_type<tc>, window_params = [{transform_indices = @transform_0, window_bounds = array<i64: 8, 32>}, {pipeline_mode = #tpu.pipeline_mode<synchronous>, transform_indices = @transform_1, window_bounds = array<i64: 32, 16>}, {pipeline_mode = #tpu.pipeline_mode<synchronous>, transform_indices = @transform_2, window_bounds = array<i64: 16, 8>}, {pipeline_mode = #tpu.pipeline_mode<synchronous>, transform_indices = @transform_3, window_bounds = array<i64: 8, 4>}, {pipeline_mode = #tpu.pipeline_mode<synchronous>, transform_indices = @transform_4, window_bounds = array<i64: 1, 16>}, {pipeline_mode = #tpu.pipeline_mode<synchronous>, transform_indices = @transform_5, window_bounds = array<i64: 1, 8>}, {pipeline_mode = #tpu.pipeline_mode<synchronous>, transform_indices = @transform_6, window_bounds = array<i64: 1, 4>}, {transform_indices = @transform_7, window_bounds = array<i64: 8, 4>}]} {
    %c0 = arith.constant 0 : index
    %c0_0 = arith.constant 0 : index
    %0 = vector.load %arg1[%c0, %c0_0] : memref<8x32xf32, #tpu.memory_space<vmem>>, vector<8x32xf32>
    %cst = arith.constant 0.000000e+00 : f32
    %1 = vector.broadcast %cst : f32 to vector<8x32xf32>
    %2 = arith.maximumf %0, %1 : vector<8x32xf32>
    %3 = arith.truncf %2 : vector<8x32xf32> to vector<8x32xbf16>
    %c0_1 = arith.constant 0 : index
    %c0_2 = arith.constant 0 : index
    %4 = vector.load %arg2[%c0_1, %c0_2] : memref<32x16xbf16, #tpu.memory_space<vmem>>, vector<32x16xbf16>
    %cst_3 = arith.constant dense<0.000000e+00> : vector<8x16xf32>
    %5 = tpu.matmul %3, %4, %cst_3 {dimension_numbers = #tpu.dot_dimension_numbers<[1], [0], [0], [1], [0, 0, 1, 1], [], []>} : vector<8x32xbf16>, vector<32x16xbf16>, vector<8x16xf32> -> vector<8x16xf32>
    %c0_4 = arith.constant 0 : index
    %c0_5 = arith.constant 0 : index
    %6 = vector.load %arg5[%c0_4, %c0_5] : memref<1x16xf32, #tpu.memory_space<vmem>>, vector<1x16xf32>
    %7 = vector.broadcast %6 : vector<1x16xf32> to vector<8x16xf32>
    %8 = arith.addf %5, %7 : vector<8x16xf32>
    %cst_6 = arith.constant 0.000000e+00 : f32
    %9 = vector.broadcast %cst_6 : f32 to vector<8x16xf32>
    %10 = arith.maximumf %8, %9 : vector<8x16xf32>
    %11 = arith.truncf %10 : vector<8x16xf32> to vector<8x16xbf16>
    %c0_7 = arith.constant 0 : index
    %c0_8 = arith.constant 0 : index
    %12 = vector.load %arg3[%c0_7, %c0_8] : memref<16x8xbf16, #tpu.memory_space<vmem>>, vector<16x8xbf16>
    %cst_9 = arith.constant dense<0.000000e+00> : vector<8x8xf32>
    %13 = tpu.matmul %11, %12, %cst_9 {dimension_numbers = #tpu.dot_dimension_numbers<[1], [0], [0], [1], [0, 0, 1, 1], [], []>} : vector<8x16xbf16>, vector<16x8xbf16>, vector<8x8xf32> -> vector<8x8xf32>
    %c0_10 = arith.constant 0 : index
    %c0_11 = arith.constant 0 : index
    %14 = vector.load %arg6[%c0_10, %c0_11] : memref<1x8xf32, #tpu.memory_space<vmem>>, vector<1x8xf32>
    %15 = vector.broadcast %14 : vector<1x8xf32> to vector<8x8xf32>
    %16 = arith.addf %13, %15 : vector<8x8xf32>
    %17 = arith.truncf %16 : vector<8x8xf32> to vector<8x8xbf16>
    %c0_12 = arith.constant 0 : index
    %c0_13 = arith.constant 0 : index
    %18 = vector.load %arg4[%c0_12, %c0_13] : memref<8x4xbf16, #tpu.memory_space<vmem>>, vector<8x4xbf16>
    %cst_14 = arith.constant dense<0.000000e+00> : vector<8x4xf32>
    %19 = tpu.matmul %17, %18, %cst_14 {dimension_numbers = #tpu.dot_dimension_numbers<[1], [0], [0], [1], [0, 0, 1, 1], [], []>} : vector<8x8xbf16>, vector<8x4xbf16>, vector<8x4xf32> -> vector<8x4xf32>
    %c0_15 = arith.constant 0 : index
    %c0_16 = arith.constant 0 : index
    %20 = vector.load %arg7[%c0_15, %c0_16] : memref<1x4xf32, #tpu.memory_space<vmem>>, vector<1x4xf32>
    %21 = vector.broadcast %20 : vector<1x4xf32> to vector<8x4xf32>
    %22 = arith.addf %19, %21 : vector<8x4xf32>
    %c0_17 = arith.constant 0 : index
    %c0_18 = arith.constant 0 : index
    %23 = vector.load %arg8[%c0_17, %c0_18] : memref<8x4xf32, #tpu.memory_space<vmem>>, vector<8x4xf32>
    tpu.vector_store %arg8[%c0_17, %c0_18], %22 {strides = array<i32>} : memref<8x4xf32, #tpu.memory_space<vmem>>, vector<8x4xf32>,
    return
  }
  func.func @transform_0(%arg0: i32) -> (i32, i32) {
    %c0_i32 = arith.constant 0 : i32
    %c0_i32_0 = arith.constant 0 : i32
    return %arg0, %c0_i32 : i32, i32
  }
  func.func @transform_1(%arg0: i32) -> (i32, i32) {
    %c0_i32 = arith.constant 0 : i32
    %c0_i32_0 = arith.constant 0 : i32
    %c0_i32_1 = arith.constant 0 : i32
    return %c0_i32, %c0_i32_0 : i32, i32
  }
  func.func @transform_2(%arg0: i32) -> (i32, i32) {
    %c0_i32 = arith.constant 0 : i32
    %c0_i32_0 = arith.constant 0 : i32
    %c0_i32_1 = arith.constant 0 : i32
    return %c0_i32, %c0_i32_0 : i32, i32
  }
  func.func @transform_3(%arg0: i32) -> (i32, i32) {
    %c0_i32 = arith.constant 0 : i32
    %c0_i32_0 = arith.constant 0 : i32
    %c0_i32_1 = arith.constant 0 : i32
    return %c0_i32, %c0_i32_0 : i32, i32
  }
  func.func @transform_4(%arg0: i32) -> (i32, i32) {
    %c0_i32 = arith.constant 0 : i32
    %c0_i32_0 = arith.constant 0 : i32
    %c0_i32_1 = arith.constant 0 : i32
    return %c0_i32, %c0_i32_0 : i32, i32
  }
  func.func @transform_5(%arg0: i32) -> (i32, i32) {
    %c0_i32 = arith.constant 0 : i32
    %c0_i32_0 = arith.constant 0 : i32
    %c0_i32_1 = arith.constant 0 : i32
    return %c0_i32, %c0_i32_0 : i32, i32
  }
  func.func @transform_6(%arg0: i32) -> (i32, i32) {
    %c0_i32 = arith.constant 0 : i32
    %c0_i32_0 = arith.constant 0 : i32
    %c0_i32_1 = arith.constant 0 : i32
    return %c0_i32, %c0_i32_0 : i32, i32
  }
  func.func @transform_7(%arg0: i32) -> (i32, i32) {
    %c0_i32 = arith.constant 0 : i32
    %c0_i32_0 = arith.constant 0 : i32
    return %arg0, %c0_i32 : i32, i32
  }
}

module attributes {stable_mosaic.version = 11 : i64} {
  func.func @kernel(%arg0: i32, %arg1: memref<8x32xf32, #tpu.memory_space<vmem>>, %arg2: memref<32x16xbf16, #tpu.memory_space<vmem>>, %arg3: memref<16x8xbf16, #tpu.memory_space<vmem>>, %arg4: memref<8x4xbf16, #tpu.memory_space<vmem>>, %arg5: memref<1x16xf32, #tpu.memory_space<vmem>>, %arg6: memref<1x8xf32, #tpu.memory_space<vmem>>, %arg7: memref<1x4xf32, #tpu.memory_space<vmem>>, %arg8: memref<8x4xf32, #tpu.memory_space<vmem>>) attributes {dimension_semantics = [#tpu.dimension_semantics<parallel>], iteration_bounds = array<i64: 1>, scalar_prefetch = 0 : i64, scratch_operands = 0 : i64, tpu.core_type = #tpu.core_type<tc>, window_params = [{transform_indices = @transform_0, window_bounds = array<i64: 8, 32>}, {pipeline_mode = #tpu.pipeline_mode<synchronous>, transform_indices = @transform_1, window_bounds = array<i64: 32, 16>}, {pipeline_mode = #tpu.pipeline_mode<synchronous>, transform_indices = @transform_2, window_bounds = array<i64: 16, 8>}, {pipeline_mode = #tpu.pipeline_mode<synchronous>, transform_indices = @transform_3, window_bounds = array<i64: 8, 4>}, {pipeline_mode = #tpu.pipeline_mode<synchronous>, transform_indices = @transform_4, window_bounds = array<i64: 1, 16>}, {pipeline_mode = #tpu.pipeline_mode<synchronous>, transform_indices = @transform_5, window_bounds = array<i64: 1, 8>}, {pipeline_mode = #tpu.pipeline_mode<synchronous>, transform_indices = @transform_6, window_bounds = array<i64: 1, 4>}, {transform_indices = @transform_7, window_bounds = array<i64: 8, 4>}]} {
    %c0 = arith.constant 0 : index
    %c0_0 = arith.constant 0 : index
    %0 = vector.load %arg1[%c0, %c0_0] : memref<8x32xf32, #tpu.memory_space<vmem>>, vector<8x32xf32>
    %cst = arith.constant 0.000000e+00 : f32
    %1 = vector.broadcast %cst : f32 to vector<8x32xf32>
    %2 = arith.maximumf %0, %1 : vector<8x32xf32>
    %3 = arith.truncf %2 : vector<8x32xf32> to vector<8x32xbf16>
    %c0_1 = arith.constant 0 : index
    %c0_2 = arith.constant 0 : index
    %4 = vector.load %arg2[%c0_1, %c0_2] : memref<32x16xbf16, #tpu.memory_space<vmem>>, vector<32x16xbf16>
    %cst_3 = arith.constant dense<0.000000e+00> : vector<8x16xf32>
    %5 = tpu.matmul %3, %4, %cst_3 {dimension_numbers = #tpu.dot_dimension_numbers<[1], [0], [0], [1], [0, 0, 1, 1], [], []>} : vector<8x32xbf16>, vector<32x16xbf16>, vector<8x16xf32> -> vector<8x16xf32>
    %c0_4 = arith.constant 0 : index
    %c0_5 = arith.constant 0 : index
    %6 = vector.load %arg5[%c0_4, %c0_5] : memref<1x16xf32, #tpu.memory_space<vmem>>, vector<1x16xf32>
    %7 = vector.broadcast %6 : vector<1x16xf32> to vector<8x16xf32>
    %8 = arith.addf %5, %7 : vector<8x16xf32>
    %cst_6 = arith.constant 0.000000e+00 : f32
    %9 = vector.broadcast %cst_6 : f32 to vector<8x16xf32>
    %10 = arith.maximumf %8, %9 : vector<8x16xf32>
    %11 = arith.truncf %10 : vector<8x16xf32> to vector<8x16xbf16>
    %c0_7 = arith.constant 0 : index
    %c0_8 = arith.constant 0 : index
    %12 = vector.load %arg3[%c0_7, %c0_8] : memref<16x8xbf16, #tpu.memory_space<vmem>>, vector<16x8xbf16>
    %cst_9 = arith.constant dense<0.000000e+00> : vector<8x8xf32>
    %13 = tpu.matmul %11, %12, %cst_9 {dimension_numbers = #tpu.dot_dimension_numbers<[1], [0], [0], [1], [0, 0, 1, 1], [], []>} : vector<8x16xbf16>, vector<16x8xbf16>, vector<8x8xf32> -> vector<8x8xf32>
    %c0_10 = arith.constant 0 : index
    %c0_11 = arith.constant 0 : index
    %14 = vector.load %arg6[%c0_10, %c0_11] : memref<1x8xf32, #tpu.memory_space<vmem>>, vector<1x8xf32>
    %15 = vector.broadcast %14 : vector<1x8xf32> to vector<8x8xf32>
    %16 = arith.addf %13, %15 : vector<8x8xf32>
    %17 = arith.truncf %16 : vector<8x8xf32> to vector<8x8xbf16>
    %c0_12 = arith.constant 0 : index
    %c0_13 = arith.constant 0 : index
    %18 = vector.load %arg4[%c0_12, %c0_13] : memref<8x4xbf16, #tpu.memory_space<vmem>>, vector<8x4xbf16>
    %cst_14 = arith.constant dense<0.000000e+00> : vector<8x4xf32>
    %19 = tpu.matmul %17, %18, %cst_14 {dimension_numbers = #tpu.dot_dimension_numbers<[1], [0], [0], [1], [0, 0, 1, 1], [], []>} : vector<8x8xbf16>, vector<8x4xbf16>, vector<8x4xf32> -> vector<8x4xf32>
    %c0_15 = arith.constant 0 : index
    %c0_16 = arith.constant 0 : index
    %20 = vector.load %arg7[%c0_15, %c0_16] : memref<1x4xf32, #tpu.memory_space<vmem>>, vector<1x4xf32>
    %21 = vector.broadcast %20 : vector<1x4xf32> to vector<8x4xf32>
    %22 = arith.addf %19, %21 : vector<8x4xf32>
    %c0_17 = arith.constant 0 : index
    %c0_18 = arith.constant 0 : index
    %23 = vector.load %arg8[%c0_17, %c0_18] : memref<8x4xf32, #tpu.memory_space<vmem>>, vector<8x4xf32>
    tpu.vector_store %arg8[%c0_17, %c0_18], %22 {strides = array<i32>} : memref<8x4xf32, #tpu.memory_space<vmem>>, vector<8x4xf32>,
    return
  }
  func.func @transform_0(%arg0: i32) -> (i32, i32) {
    %c0_i32 = arith.constant 0 : i32
    %c0_i32_0 = arith.constant 0 : i32
    return %arg0, %c0_i32 : i32, i32
  }
  func.func @transform_1(%arg0: i32) -> (i32, i32) {
    %c0_i32 = arith.constant 0 : i32
    %c0_i32_0 = arith.constant 0 : i32
    %c0_i32_1 = arith.constant 0 : i32
    return %c0_i32, %c0_i32_0 : i32, i32
  }
  func.func @transform_2(%arg0: i32) -> (i32, i32) {
    %c0_i32 = arith.constant 0 : i32
    %c0_i32_0 = arith.constant 0 : i32
    %c0_i32_1 = arith.constant 0 : i32
    return %c0_i32, %c0_i32_0 : i32, i32
  }
  func.func @transform_3(%arg0: i32) -> (i32, i32) {
    %c0_i32 = arith.constant 0 : i32
    %c0_i32_0 = arith.constant 0 : i32
    %c0_i32_1 = arith.constant 0 : i32
    return %c0_i32, %c0_i32_0 : i32, i32
  }
  func.func @transform_4(%arg0: i32) -> (i32, i32) {
    %c0_i32 = arith.constant 0 : i32
    %c0_i32_0 = arith.constant 0 : i32
    %c0_i32_1 = arith.constant 0 : i32
    return %c0_i32, %c0_i32_0 : i32, i32
  }
  func.func @transform_5(%arg0: i32) -> (i32, i32) {
    %c0_i32 = arith.constant 0 : i32
    %c0_i32_0 = arith.constant 0 : i32
    %c0_i32_1 = arith.constant 0 : i32
    return %c0_i32, %c0_i32_0 : i32, i32
  }
  func.func @transform_6(%arg0: i32) -> (i32, i32) {
    %c0_i32 = arith.constant 0 : i32
    %c0_i32_0 = arith.constant 0 : i32
    %c0_i32_1 = arith.constant 0 : i32
    return %c0_i32, %c0_i32_0 : i32, i32
  }
  func.func @transform_7(%arg0: i32) -> (i32, i32) {
    %c0_i32 = arith.constant 0 : i32
    %c0_i32_0 = arith.constant 0 : i32
    return %arg0, %c0_i32 : i32, i32
  }
}

</mosaic_0001>

<bundles_post_ra>
// kernel: tpu_custom_call.1
= control target key start
LH: loop header
LB: loop body
LE: loop exit
PB: predicated region body
PF: predicated region fallthrough
CT: control target
= control target key end

     0   :  { %v262_v0 = vmov 0.0   ;;  %vm263_vm0 = vmmov 0   ;;  %vm53_vm1 = vcmask 261120   ;;  %vm171_vm2 = vcmask 1043456   ;;  %s334_s1 = inlined_call_operand.vmem [shape: bf16[32,16], index: 1, kind: input, shape index: {}]   ;;  %s335_s0 = inlined_call_operand.vmem [shape: f32[8,32], index: 0, kind: input, shape index: {}]   ;;  %s336_s2 = inlined_call_operand.vmem [shape: bf16[16,8], index: 2, kind: input, shape index: {}]   ;;  %s337_s4 = inlined_call_operand.vmem [shape: f32[1,16], index: 4, kind: input, shape index: {}]   ;;  %s338_s3 = inlined_call_operand.vmem [shape: bf16[8,4], index: 3, kind: input, shape index: {}]   ;;  %s339_s5 = inlined_call_operand.vmem [shape: f32[1,8], index: 5, kind: input, shape index: {}]   ;;  %s340_s6 = inlined_call_operand.vmem [shape: f32[1,4], index: 6, kind: input, shape index: {}]   ;;  %s341_s7 = inlined_call_operand.vmem [shape: f32[8,4], index: 7, kind: output, shape index: {}]  }
   0x1   :  { %237 = vmatprep.subr.bf16.mxu0 %v262_v0  ;;  %v259_v1 = vld [vmem:[%s334_s1 + $0x8] sm:$0xff]   ;;  %241 = vmatprep.mubr.msk.bf16.mxu0 %vm263_vm0, %v262_v0  ;;  %v260_v2 = vld [vmem:[%s334_s1] sm:$0xff]   ;;  %vm114_vm3 = vcmask 130048   ;;  %vm167_vm4 = vcmask 64512   ;;  %vm215_vm5 = vcmask 31744  }
   0x2   :  { %245 = vmatprep.subr.bf16.mxu1 %v262_v0  ;;  %247 = vmatprep.mubr.msk.bf16.mxu1 %vm263_vm0, %v262_v0  ;;  %v27_v3 = vld [vmem:[%s335_s0] sm:$0xff] }
   0x3   :  { %238 = vmatpush3.bf16.msra.mxu0 %v259_v1  ;;  %v28_v4 = vmax.f32 %v27_v3, 0.0  ;;  %v261_v6 = vld [vmem:[%s336_s2] sm:$0xff]  }
   0x4   :  { %239 = vmatprep.subr.bf16.mxu0 %v262_v0  ;;  %246 = vmatpush3.bf16.msra.mxu1 %v261_v6  ;;  %v221_v7 = vld [vmem:[%s337_s4] ss:$0 sm:$0xff] }
   0x5   :  { %v29_v5 = vpack.c.bf16 %v28_v4, %v28_v4  ;;  %251 = vmatprep.subr.bf16.mxu1 %v262_v0  ;;  %v159_v11 = vld [vmem:[%s338_s3] sm:$0xf] }
   0x6   :  { %v173_v15 = vsel %vm171_vm2, %v159_v11, 0  ;;  %v225_v17 = vld [vmem:[%s339_s5] ss:$0 sm:$0xff] }
   0x7   :  { %240 = vmatpush3.bf16.msra.mxu0 %v260_v2  ;;  %v228_v24 = vld [vmem:[%s340_s6] ss:$0 sm:$0xff] }
   0xa   :  { %242 = vmatmul.mubr.msk.bf16.vlgmr.msra.gmra.mxu0 %vm53_vm1, %v29_v5 }
  0xca   :  { %v91_v8 = vpop.f32.mrf.mxu0 }
  0xcb   :  { %v92_v9 = vadd.f32 %v221_v7, %v91_v8 }
  0xcc   :  { %v243_v10 = vpop.f32.mrf.mxu0 }
  0xcd   :  { %v97_v12 = vmax.f32 %v92_v9, 0.0 }
  0xce   :  { %v94_v13 = vpop.f32.mrf.mxu0 }
  0xcf   :  { %v98_v14 = vpack.c.bf16 %v97_v12, %v97_v12 }
  0xd0   :  { %v244_v16 = vpop.f32.mrf.mxu0 }
  0xd1   :  { %248 = vmatmul.mubr.msk.bf16.vlgmr.msra.gmra.mxu1 %vm114_vm3, %v98_v14 }
  0xd2   :  { %252 = vmatpush3.bf16.msra.mxu1 %v173_v15  ;;  %253 = vmatprep.mubr.msk.bf16.mxu1 %vm263_vm0, %v262_v0 }
 0x191   :  { %v152_v18 = vpop.f32.mrf.mxu1 }
 0x192   :  { %v153_v19 = vadd.f32 %v225_v17, %v152_v18 }
 0x193   :  { %v249_v20 = vpop.f32.mrf.mxu1 }
 0x194   :  { %v158_v21 = vpack.c.bf16 %v153_v19, %v153_v19 }
 0x195   :  { %v155_v22 = vpop.f32.mrf.mxu1 }
 0x196   :  { %254 = vmatmul.mubr.msk.bf16.vlgmr.msra.gmra.mxu1 %vm167_vm4, %v158_v21 }
 0x197   :  { %v250_v23 = vpop.f32.mrf.mxu1 }
 0x256   :  { %v209_v25 = vpop.f32.mrf.mxu1 }
 0x257   :  { %v210_v26 = vadd.f32 %v228_v24, %v209_v25 }
 0x258   :  { %v255_v27 = vpop.f32.mrf.mxu1 }
 0x259   :  { %216 = vst.msk [vmem:[%s341_s7] sm:$0xff] %vm215_vm5, %v210_v26 }
 0x25a   :  { %v212_v28 = vpop.f32.mrf.mxu1 }
 0x25c   :  { %v256_v29 = vpop.f32.mrf.mxu1 }

// kernel: tpu_custom_call.1
= control target key start
LH: loop header
LB: loop body
LE: loop exit
PB: predicated region body
PF: predicated region fallthrough
CT: control target
= control target key end

     0   :  { %v262_v0 = vmov 0.0   ;;  %vm263_vm0 = vmmov 0   ;;  %vm53_vm1 = vcmask 261120   ;;  %vm171_vm2 = vcmask 1043456   ;;  %s334_s1 = inlined_call_operand.vmem [shape: bf16[32,16], index: 1, kind: input, shape index: {}]   ;;  %s335_s0 = inlined_call_operand.vmem [shape: f32[8,32], index: 0, kind: input, shape index: {}]   ;;  %s336_s2 = inlined_call_operand.vmem [shape: bf16[16,8], index: 2, kind: input, shape index: {}]   ;;  %s337_s4 = inlined_call_operand.vmem [shape: f32[1,16], index: 4, kind: input, shape index: {}]   ;;  %s338_s3 = inlined_call_operand.vmem [shape: bf16[8,4], index: 3, kind: input, shape index: {}]   ;;  %s339_s5 = inlined_call_operand.vmem [shape: f32[1,8], index: 5, kind: input, shape index: {}]   ;;  %s340_s6 = inlined_call_operand.vmem [shape: f32[1,4], index: 6, kind: input, shape index: {}]   ;;  %s341_s7 = inlined_call_operand.vmem [shape: f32[8,4], index: 7, kind: output, shape index: {}]  }
   0x1   :  { %237 = vmatprep.subr.bf16.mxu0 %v262_v0  ;;  %v259_v1 = vld [vmem:[%s334_s1 + $0x8] sm:$0xff]   ;;  %241 = vmatprep.mubr.msk.bf16.mxu0 %vm263_vm0, %v262_v0  ;;  %v260_v2 = vld [vmem:[%s334_s1] sm:$0xff]   ;;  %vm114_vm3 = vcmask 130048   ;;  %vm167_vm4 = vcmask 64512   ;;  %vm215_vm5 = vcmask 31744  }
   0x2   :  { %245 = vmatprep.subr.bf16.mxu1 %v262_v0  ;;  %247 = vmatprep.mubr.msk.bf16.mxu1 %vm263_vm0, %v262_v0  ;;  %v27_v3 = vld [vmem:[%s335_s0] sm:$0xff] }
   0x3   :  { %238 = vmatpush3.bf16.msra.mxu0 %v259_v1  ;;  %v28_v4 = vmax.f32 %v27_v3, 0.0  ;;  %v261_v6 = vld [vmem:[%s336_s2] sm:$0xff]  }
   0x4   :  { %239 = vmatprep.subr.bf16.mxu0 %v262_v0  ;;  %246 = vmatpush3.bf16.msra.mxu1 %v261_v6  ;;  %v221_v7 = vld [vmem:[%s337_s4] ss:$0 sm:$0xff] }
   0x5   :  { %v29_v5 = vpack.c.bf16 %v28_v4, %v28_v4  ;;  %251 = vmatprep.subr.bf16.mxu1 %v262_v0  ;;  %v159_v11 = vld [vmem:[%s338_s3] sm:$0xf] }
   0x6   :  { %v173_v15 = vsel %vm171_vm2, %v159_v11, 0  ;;  %v225_v17 = vld [vmem:[%s339_s5] ss:$0 sm:$0xff] }
   0x7   :  { %240 = vmatpush3.bf16.msra.mxu0 %v260_v2  ;;  %v228_v24 = vld [vmem:[%s340_s6] ss:$0 sm:$0xff] }
   0xa   :  { %242 = vmatmul.mubr.msk.bf16.vlgmr.msra.gmra.mxu0 %vm53_vm1, %v29_v5 }
  0xca   :  { %v91_v8 = vpop.f32.mrf.mxu0 }
  0xcb   :  { %v92_v9 = vadd.f32 %v221_v7, %v91_v8 }
  0xcc   :  { %v243_v10 = vpop.f32.mrf.mxu0 }
  0xcd   :  { %v97_v12 = vmax.f32 %v92_v9, 0.0 }
  0xce   :  { %v94_v13 = vpop.f32.mrf.mxu0 }
  0xcf   :  { %v98_v14 = vpack.c.bf16 %v97_v12, %v97_v12 }
  0xd0   :  { %v244_v16 = vpop.f32.mrf.mxu0 }
  0xd1   :  { %248 = vmatmul.mubr.msk.bf16.vlgmr.msra.gmra.mxu1 %vm114_vm3, %v98_v14 }
  0xd2   :  { %252 = vmatpush3.bf16.msra.mxu1 %v173_v15  ;;  %253 = vmatprep.mubr.msk.bf16.mxu1 %vm263_vm0, %v262_v0 }
 0x191   :  { %v152_v18 = vpop.f32.mrf.mxu1 }
 0x192   :  { %v153_v19 = vadd.f32 %v225_v17, %v152_v18 }
 0x193   :  { %v249_v20 = vpop.f32.mrf.mxu1 }
 0x194   :  { %v158_v21 = vpack.c.bf16 %v153_v19, %v153_v19 }
 0x195   :  { %v155_v22 = vpop.f32.mrf.mxu1 }
 0x196   :  { %254 = vmatmul.mubr.msk.bf16.vlgmr.msra.gmra.mxu1 %vm167_vm4, %v158_v21 }
 0x197   :  { %v250_v23 = vpop.f32.mrf.mxu1 }
 0x256   :  { %v209_v25 = vpop.f32.mrf.mxu1 }
 0x257   :  { %v210_v26 = vadd.f32 %v228_v24, %v209_v25 }
 0x258   :  { %v255_v27 = vpop.f32.mrf.mxu1 }
 0x259   :  { %216 = vst.msk [vmem:[%s341_s7] sm:$0xff] %vm215_vm5, %v210_v26 }
 0x25a   :  { %v212_v28 = vpop.f32.mrf.mxu1 }
 0x25c   :  { %v256_v29 = vpop.f32.mrf.mxu1 }

</bundles_post_ra>
